<compile_context>
chip_gen: v7x
topology: tpu7x:2x2x1
jax: 0.10.0
libtpu: 0.0.40
codegen_flags: <defaults>
</compile_context>

<pallas_src>
import numpy as np
import jax
import jax.numpy as jnp
from jax.experimental import pallas as pl
from jax.experimental.pallas import tpu as pltpu


def _round_up(x, m):
    return ((x + m - 1) // m) * m


# ---------------------------------------------------------------------------
# Kernel 1: projection   h = (feat * out_deg^{-1/2}) @ W      -> (N_src, Dpad)
# ---------------------------------------------------------------------------
def _project_kernel(feat_ref, out_rsqrt_ref, w_ref, h_ref):
    feat_scaled = feat_ref[...] * out_rsqrt_ref[...]        # (tk, Din) * (tk, 1), f32 VPU
    h_ref[...] = jnp.dot(feat_scaled, w_ref[...],
                         preferred_element_type=jnp.float32).astype(h_ref.dtype)


# ---------------------------------------------------------------------------
# Kernel 2: aggregation   out = (aw @ h) * in_deg^{-1/2} + bias
#   grid = (dst-row tiles [parallel], src-col reduction tiles [arbitrary])
# ---------------------------------------------------------------------------
def _aggregate_kernel(aw_ref, h_ref, in_rsqrt_ref, bias_ref, out_ref, acc_ref):
    k = pl.program_id(1)

    @pl.when(k == 0)
    def _():
        acc_ref[...] = jnp.zeros_like(acc_ref)

    acc_ref[...] += jnp.dot(aw_ref[...], h_ref[...],
                            preferred_element_type=jnp.float32)

    @pl.when(k == pl.num_programs(1) - 1)
    def _():
        # Finalize only once: fold in destination-degree norm and bias.
        out_ref[...] = (acc_ref[...] * in_rsqrt_ref[...]
                        + bias_ref[...]).astype(out_ref.dtype)


def graph_conv_v2(adj, aw, feat, weight, bias, *, tile_m=512, tile_k=512,
                  matmul_dtype=jnp.float32):
    """GCN forward. adj/aw are (N_dst, N_src) dense; feat (N, Din); weight (Din, Dout).

    Set matmul_dtype=jnp.bfloat16 on v6e/v7x to halve the (N,N) aw stream for the hot
    aggregation matmul (f32 accumulation is kept either way).
    """
    N, din = feat.shape
    dout = weight.shape[1]

    # ---- graph metadata precomputed outside the kernels (norm='both', clamp >= 1) ----
    out_deg = jnp.maximum(jnp.sum(adj, axis=0), 1.0)                 # (N,) src out-degree
    in_deg = jnp.maximum(jnp.sum(adj, axis=1), 1.0)                  # (N,) dst in-degree
    out_rsqrt = (out_deg ** -0.5).astype(jnp.float32).reshape(N, 1)
    in_rsqrt = (in_deg ** -0.5).astype(jnp.float32).reshape(N, 1)

    # ---- tile sizes / padding (lane-dense output, (8,128)-legal blocks) ----
    dpad = _round_up(dout, 128)                    # 128-wide output -> unmasked stores
    tm = min(tile_m, _round_up(N, 8))              # dst-row tile
    tk = min(tile_k, _round_up(N, 8))              # src-col (reduction) tile
    n_dst = _round_up(N, tm)
    n_src = _round_up(N, tk)

    feat_p = jnp.pad(feat.astype(jnp.float32), ((0, n_src - N), (0, 0)))
    out_rsqrt_p = jnp.pad(out_rsqrt, ((0, n_src - N), (0, 0)))
    in_rsqrt_p = jnp.pad(in_rsqrt, ((0, n_dst - N), (0, 0)))
    w_p = jnp.pad(weight.astype(jnp.float32), ((0, 0), (0, dpad - dout)))
    bias_p = jnp.pad(bias.astype(jnp.float32).reshape(1, dout),
                     ((0, 0), (0, dpad - dout)))
    aw_p = jnp.pad(aw, ((0, n_dst - N), (0, n_src - N))).astype(matmul_dtype)

    # ---- stage 1: project (tiny, N*Dout) ----
    h = pl.pallas_call(
        _project_kernel,
        out_shape=jax.ShapeDtypeStruct((n_src, dpad), matmul_dtype),
        grid_spec=pltpu.PrefetchScalarGridSpec(
            num_scalar_prefetch=0,
            grid=(n_src // tk,),
            in_specs=[
                pl.BlockSpec((tk, din), lambda i: (i, 0)),
                pl.BlockSpec((tk, 1), lambda i: (i, 0)),
                pl.BlockSpec((din, dpad), lambda i: (0, 0)),
            ],
            out_specs=pl.BlockSpec((tk, dpad), lambda i: (i, 0)),
        ),
        compiler_params=pltpu.CompilerParams(
            dimension_semantics=("parallel",)),
    )(feat_p, out_rsqrt_p, w_p)

    # ---- stage 2: aggregate (hot path: pipelined (N,N) aw stream on the MXU) ----
    itemsize = jnp.dtype(matmul_dtype).itemsize
    cost = pl.CostEstimate(
        flops=2 * n_dst * n_src * dpad,
        transcendentals=0,
        bytes_accessed=(n_dst * n_src * itemsize       # aw
                        + n_src * dpad * itemsize      # h
                        + n_dst * dpad * 4),           # out
    )

    out_p = pl.pallas_call(
        _aggregate_kernel,
        out_shape=jax.ShapeDtypeStruct((n_dst, dpad), jnp.float32),
        grid_spec=pltpu.PrefetchScalarGridSpec(
            num_scalar_prefetch=0,
            grid=(n_dst // tm, n_src // tk),
            in_specs=[
                pl.BlockSpec((tm, tk), lambda i, k: (i, k)),    # aw tile
                pl.BlockSpec((tk, dpad), lambda i, k: (k, 0)),  # projected feats
                pl.BlockSpec((tm, 1), lambda i, k: (i, 0)),     # in-degree rsqrt
                pl.BlockSpec((1, dpad), lambda i, k: (0, 0)),   # bias
            ],
            out_specs=pl.BlockSpec((tm, dpad), lambda i, k: (i, 0)),
            scratch_shapes=[pltpu.VMEM((tm, dpad), jnp.float32)],
        ),
        compiler_params=pltpu.CompilerParams(
            dimension_semantics=("parallel", "arbitrary")),
        cost_estimate=cost,
    )(aw_p, h, in_rsqrt_p, bias_p)

    return out_p[:N, :dout]


def reference(adj, aw, feat, weight, bias):
    # Pure-JAX reference following the exact op order of the PyTorch module
    # (in_feats > out_feats branch, norm='both').
    out_deg = jnp.maximum(jnp.sum(adj, axis=0), 1.0)
    feat_src = feat * (out_deg ** -0.5)[:, None]
    h = feat_src @ weight
    rst = aw @ h
    in_deg = jnp.maximum(jnp.sum(adj, axis=1), 1.0)
    rst = rst * (in_deg ** -0.5)[:, None]
    return rst + bias


if __name__ == "__main__":
    N = 256          # number of nodes
    IN_FEATS = 64
    OUT_FEATS = 8    # in_feats > out_feats -> "project then aggregate" branch

    key = jax.random.PRNGKey(0)
    k_adj, k_ew, k_feat, k_w = jax.random.split(key, 4)

    # Random graph structure with self-loops (no 0-in-degree nodes).
    adj = (jax.random.uniform(k_adj, (N, N)) < 0.05).astype(jnp.float32)
    adj = jnp.maximum(adj, jnp.eye(N, dtype=jnp.float32))
    # Edge weights (eweight), dense on the adjacency pattern.
    aw = adj * jax.random.uniform(k_ew, (N, N), minval=0.5, maxval=1.5)

    feat = jax.random.normal(k_feat, (N, IN_FEATS), dtype=jnp.float32)

    # Glorot/Xavier-uniform weight, zero bias (module's reset_parameters()).
    bound = float(np.sqrt(6.0 / (IN_FEATS + OUT_FEATS)))
    weight = jax.random.uniform(k_w, (IN_FEATS, OUT_FEATS),
                                minval=-bound, maxval=bound, dtype=jnp.float32)
    bias = jnp.zeros((OUT_FEATS,), dtype=jnp.float32)

    # Small tiles so the test exercises the (parallel, reduction) grid: grid = (2, 2).
    out = graph_conv_v2(adj, aw, feat, weight, bias, tile_m=128, tile_k=128)
    out = jax.block_until_ready(out)

    ref = reference(adj, aw, feat, weight, bias)
    np.testing.assert_allclose(np.asarray(out), np.asarray(ref), rtol=1e-4, atol=1e-4)

    print("KERNEL_OK")
</pallas_src>

<mosaic_0001>
module attributes {stable_mosaic.version = 11 : i64} {
  func.func @_project_kernel(%arg0: i32, %arg1: memref<128x64xf32, #tpu.memory_space<vmem>>, %arg2: memref<128x1xf32, #tpu.memory_space<vmem>>, %arg3: memref<64x128xf32, #tpu.memory_space<vmem>>, %arg4: memref<128x128xf32, #tpu.memory_space<vmem>>) attributes {dimension_semantics = [#tpu.dimension_semantics<parallel>], iteration_bounds = array<i64: 2>, scalar_prefetch = 0 : i64, scratch_operands = 0 : i64, tpu.core_type = #tpu.core_type<tc>, window_params = [{transform_indices = @transform_0, window_bounds = array<i64: 128, 64>}, {transform_indices = @transform_1, window_bounds = array<i64: 128, 1>}, {pipeline_mode = #tpu.pipeline_mode<synchronous>, transform_indices = @transform_2, window_bounds = array<i64: 64, 128>}, {transform_indices = @transform_3, window_bounds = array<i64: 128, 128>}]} {
    %c0 = arith.constant 0 : index
    %c0_0 = arith.constant 0 : index
    %0 = vector.load %arg1[%c0, %c0_0] : memref<128x64xf32, #tpu.memory_space<vmem>>, vector<128x64xf32>
    %c0_1 = arith.constant 0 : index
    %c0_2 = arith.constant 0 : index
    %1 = vector.load %arg2[%c0_1, %c0_2] : memref<128x1xf32, #tpu.memory_space<vmem>>, vector<128x1xf32>
    %2 = vector.broadcast %1 : vector<128x1xf32> to vector<128x64xf32>
    %3 = arith.mulf %0, %2 : vector<128x64xf32>
    %c0_3 = arith.constant 0 : index
    %c0_4 = arith.constant 0 : index
    %4 = vector.load %arg3[%c0_3, %c0_4] : memref<64x128xf32, #tpu.memory_space<vmem>>, vector<64x128xf32>
    %cst = arith.constant dense<0.000000e+00> : vector<128x128xf32>
    %5 = tpu.matmul %3, %4, %cst {dimension_numbers = #tpu.dot_dimension_numbers<[1], [0], [0], [1], [0, 0, 1, 1], [], []>} : vector<128x64xf32>, vector<64x128xf32>, vector<128x128xf32> -> vector<128x128xf32>
    %c0_5 = arith.constant 0 : index
    %c0_6 = arith.constant 0 : index
    %6 = vector.load %arg4[%c0_5, %c0_6] : memref<128x128xf32, #tpu.memory_space<vmem>>, vector<128x128xf32>
    tpu.vector_store %arg4[%c0_5, %c0_6], %5 {strides = array<i32>} : memref<128x128xf32, #tpu.memory_space<vmem>>, vector<128x128xf32>,
    return
  }
  func.func @transform_0(%arg0: i32) -> (i32, i32) {
    %c0_i32 = arith.constant 0 : i32
    %c0_i32_0 = arith.constant 0 : i32
    return %arg0, %c0_i32 : i32, i32
  }
  func.func @transform_1(%arg0: i32) -> (i32, i32) {
    %c0_i32 = arith.constant 0 : i32
    %c0_i32_0 = arith.constant 0 : i32
    return %arg0, %c0_i32 : i32, i32
  }
  func.func @transform_2(%arg0: i32) -> (i32, i32) {
    %c0_i32 = arith.constant 0 : i32
    %c0_i32_0 = arith.constant 0 : i32
    %c0_i32_1 = arith.constant 0 : i32
    return %c0_i32, %c0_i32_0 : i32, i32
  }
  func.func @transform_3(%arg0: i32) -> (i32, i32) {
    %c0_i32 = arith.constant 0 : i32
    %c0_i32_0 = arith.constant 0 : i32
    return %arg0, %c0_i32 : i32, i32
  }
}

</mosaic_0001>

<bundles_post_ra>
// kernel: tpu_custom_call.1
= control target key start
LH: loop header
LB: loop body
LE: loop exit
PB: predicated region body
PF: predicated region fallthrough
CT: control target
= control target key end

     0   :  { %8 = vsyncpa [#allocation3], 0  ;;  %s1090_s0 = inlined_call_operand.vmem [shape: f32[256,64], index: 0, kind: input, shape index: {}]   ;;  %s1091_s1 = inlined_call_operand.vmem [shape: f32[256,1], index: 1, kind: input, shape index: {}]   ;;  %s1092_s2 = inlined_call_operand.vmem [shape: f32[64,128], index: 2, kind: input, shape index: {}]   ;;  %s1093_s3 = inlined_call_operand.hbm [shape: f32[256,128], index: 3, kind: output, shape index: {}]  }
   0x1   :  { %10 = vsyncpa [#allocation3 + $0x1], 0  ;;  %s879_s12 = smov 0   ;;  %s881_s13 = smov 0  }
   0x2   :  { %s883_s14 = smov 0   ;;  %s885_s15 = smov 0  }
   0x3 LB: > { %s900_s16 = sadd.s32 4294967295, %s853_s15   ;;  %s628_s17 = sadd.s32 4294967294, %s853_s15   ;;  %s853_s15 = sphi %s885_s15, %s1099_s15   ;;  %s849_s14 = sphi %s883_s14, %s1098_s14   ;;  %s845_s13 = sphi %s881_s13, %s1097_s13   ;;  %s841_s12 = sphi %s879_s12, %s1096_s12  }
   0x4   : > { %s904_s18 = sadd.s32 1, %s853_s15   ;;  %s96_s19 = sadd.s32 1, %s849_s14 }
   0x5   : > { %s93_s20 = ssub.s32 %s853_s15, %s904_s18  ;;  %p106_p0 = scmp.ne.s32.totalorder %s849_s14, %s845_s13 }
   0x6   : > { %p94_p1 = scmp.eq.s32.totalorder %s93_s20, 0  ;;  %p107_p2 = scmp.eq.s32.totalorder %s900_s16, 1 }
   0x7   : > { %p112_p3 = scmp.ne.s32.totalorder %s845_s13, %s841_s12  ;;  %p113_p4 = scmp.eq.s32.totalorder %s628_s17, 1 }
   0x8   : > { %s915_s21 = scalar_select %p94_p1, %s849_s14, %s96_s19  }
   0x9   : > { %p917_p5 = por %p107_p2, %p106_p0  ;;  %p921_p6 = por %p113_p4, %p112_p3 }
   0xa   : > { %p631_p7 = scmp.ge.s32.totalorder %s853_s15, 1  ;;  %p152_p8 = scmp.lt.s32.totalorder %s853_s15, 3 }
   0xc   : > { %p153_p9 = pnand %p631_p7, %p152_p8 }
   0xd   : > { %s633_s24 = sshll.u32 (!%p153_p9), %s900_s16, 4  ;;  %v322_v0 = vld [vmem:[%s1092_s2] sm:$0xff] (!%p153_p9)  ;;  %v323_v1 = vld [vmem:[%s1092_s2 + $0x8] sm:$0xff] (!%p153_p9)  ;;  %v324_v2 = vld [vmem:[%s1092_s2 + $0x10] sm:$0xff] (!%p153_p9)  ;;  %v855_v3 = vmov (!%p153_p9), 0   ;;  %vm330_vm0 = vcmask (!%p153_p9), 523264  }
   0xe   : > { %156 = sbr.rel (%p153_p9) target bundleno = 411 (0x19b), region = 32  ;;  %790 = vset.pattern.permute.xlu1 (!%p153_p9), %v855_v3  ;;  %789 = vset.pattern.permute.xlu0 (!%p153_p9), %v855_v3  ;;  %p182_p10 = scmp.lt.s32.totalorder (!%p153_p9), %s633_s24, 31  ;;  %v723_v4 = vpack.c.bf16 (!%p153_p9), %v323_v1, %v322_v0  ;;  %v325_v5 = vld [vmem:[%s1092_s2 + $0x18] sm:$0xff] (!%p153_p9)  ;;  %v326_v7 = vld [vmem:[%s1092_s2 + $0x20] sm:$0xff] (!%p153_p9)  ;;  %v327_v8 = vld [vmem:[%s1092_s2 + $0x28] sm:$0xff] (!%p153_p9) }
   0xf   : > { %v727_v6 = vpack.c.bf16 (!%p153_p9), %v325_v5, %v324_v2  ;;  %v731_v9 = vpack.c.bf16 (!%p153_p9), %v327_v8, %v326_v7  ;;  %v328_v10 = vld [vmem:[%s1092_s2 + $0x30] sm:$0xff] (!%p153_p9)  ;;  %v329_v13 = vld [vmem:[%s1092_s2 + $0x38] sm:$0xff] (!%p153_p9)  ;;  %s658_s6 = sshll.u32 (!%p153_p9), %s900_s16, 11  ;;  %s856_s17 = smov (!%p153_p9), [#allocation2]  }
  0x10   : > { %724 = vmatprep.subr.bf16.mxu0 (!%p153_p9), %v723_v4  ;;  %739 = vmatprep.subr.bf16.mxu1 (!%p153_p9), %v723_v4  ;;  %v735_v16 = vpack.c.bf16 (!%p153_p9), %v329_v13, %v328_v10 }
  0x11   : > { %726 = vmatpush3.bf16.msra.mxu0 (!%p153_p9), %v723_v4  ;;  %743 = vmatpush3.bf16.msra.mxu1 (!%p153_p9), %v723_v4 }
  0x12   : > { %728 = vmatprep.subr.bf16.mxu0 (!%p153_p9), %v727_v6  ;;  %740 = vmatprep.subr.bf16.mxu1 (!%p153_p9), %v727_v6 }
  0x15   : > { %s1101_s24 = smov (!%p182_p10, %s633_s24), 31  ;;  %730 = vmatpush3.bf16.msra.mxu0 %v727_v6  ;;  %744 = vmatpush3.bf16.msra.mxu1 %v727_v6 }
  0x16   : > { %s634_s10 = sshll.u32 %s1101_s24, 3  ;;  %732 = vmatprep.subr.bf16.mxu0 %v731_v9  ;;  %741 = vmatprep.subr.bf16.mxu1 %v731_v9  ;;  %s178_s24 = sand.u32 1, %s845_s13  }
  0x17   : > { %s954_s19 = scalar_lea.vmem %s1091_s1, %s634_s10  ;;  %s983_s30 = scalar_lea.vmem %s1090_s0, %s634_s10 }
  0x18   : > { %v211_v11 = vld [vmem:[%s954_s19 + $0x8] sm:$0xff]  ;;  %v210_v12 = vld [vmem:[%s954_s19] sm:$0xff]  ;;  %v220_v17 = vld [vmem:[%s954_s19 + $0x50] sm:$0xff]  ;;  %s632_s4 = sshll.u32 %s178_s24, 7  ;;  %s1039_s10 = scalar_lea.hbm %s1093_s3, %s658_s6 }
  0x19   : > { %233 = vperm.xlu1 %790, %v211_v11   ;;  %228 = vperm.xlu0 %789, %v210_v12   ;;  %v219_v14 = vld [vmem:[%s954_s19 + $0x48] sm:$0xff]  ;;  %v218_v15 = vld [vmem:[%s954_s19 + $0x40] sm:$0xff]  ;;  %v212_v18 = vld [vmem:[%s954_s19 + $0x10] sm:$0xff]  ;;  %s1020_s5 = scalar_lea.vmem [#allocation2], %s632_s4  ;;  %s1049_s16 = scalar_lea.sflag [#allocation3], %s178_s24 }
  0x1a   : > { %734 = vmatpush3.bf16.msra.mxu0 %v731_v9  ;;  %745 = vmatpush3.bf16.msra.mxu1 %v731_v9  ;;  %v221_v19 = vld [vmem:[%s954_s19 + $0x58] sm:$0xff]  ;;  %v222_v21 = vld [vmem:[%s954_s19 + $0x60] sm:$0xff]  ;;  %v223_v23 = vld [vmem:[%s954_s19 + $0x68] sm:$0xff]  ;;  %s554_s7 = sshll.u32 %s1020_s5, 4  ;;  %s1041_s7 = int_to_ptr.vmem [resolvable:$true] %s554_s7 }
  0x1b   : > { %736 = vmatprep.subr.bf16.mxu0 %v735_v16  ;;  %742 = vmatprep.subr.bf16.mxu1 %v735_v16  ;;  %v213_v20 = vld [vmem:[%s954_s19 + $0x18] sm:$0xff]  ;;  %v214_v22 = vld [vmem:[%s954_s19 + $0x20] sm:$0xff]  ;;  %v215_v24 = vld [vmem:[%s954_s19 + $0x28] sm:$0xff]  ;;  %s791_s11 = scalar_lea.vmem %s1041_s7, 2048 }
  0x1c   : > { %v224_v25 = vld [vmem:[%s954_s19 + $0x70] sm:$0xff]  ;;  %v225_v27 = vld [vmem:[%s954_s19 + $0x78] sm:$0xff]  ;;  %v195_v29 = vld [vmem:[%s983_s30 + $0x8] sm:$0xff]  ;;  %p792_p11 = scmp.ne.s32.totalorder %s1041_s7, %s791_s11 }
  0x1d   : > { %273 = vperm.xlu1 %790, %v219_v14   ;;  %268 = vperm.xlu0 %789, %v218_v15   ;;  %v216_v26 = vld [vmem:[%s954_s19 + $0x30] sm:$0xff]  ;;  %v217_v28 = vld [vmem:[%s954_s19 + $0x38] sm:$0xff]  ;;  %v194_v30 = vld [vmem:[%s983_s30] sm:$0xff]  ;;  %s795_s19 = sshll.u32 %s856_s17, 4  ;;  %s796_s19 = int_to_ptr.vmem [resolvable:$false] %s795_s19 }
  0x1e   : > { %738 = vmatpush3.bf16.msra.mxu0 %v735_v16  ;;  %746 = vmatpush3.bf16.msra.mxu1 %v735_v16  ;;  %v203_v35 = vld [vmem:[%s983_s30 + $0x48] sm:$0xff]  ;;  %v202_v36 = vld [vmem:[%s983_s30 + $0x40] sm:$0xff]  ;;  %v204_v41 = vld [vmem:[%s983_s30 + $0x50] sm:$0xff]  ;;  %p793_p12 = pnand %p792_p11, %p917_p5  ;;  %s797_s20 = scalar_lea.vmem %s796_s19, 4096 }
  0x1f   : > { %v196_v42 = vld [vmem:[%s983_s30 + $0x10] sm:$0xff]  ;;  %v205_v47 = vld [vmem:[%s983_s30 + $0x58] sm:$0xff]  ;;  %v206_v53 = vld [vmem:[%s983_s30 + $0x60] sm:$0xff]  ;;  %p798_p0 = scmp.lt.s32.totalorder %s1041_s7, %s796_s19  ;;  %p799_p1 = scmp.lt.s32.totalorder %s797_s20, %s791_s11 }
  0x20   : > { %v197_v48 = vld [vmem:[%s983_s30 + $0x18] sm:$0xff]  ;;  %v198_v54 = vld [vmem:[%s983_s30 + $0x20] sm:$0xff]  ;;  %v207_v59 = vld [vmem:[%s983_s30 + $0x68] sm:$0xff]  ;;  %p794_p13 = pneg %p793_p12 }
  0x21   : > { %278 = vperm.xlu1 %790, %v220_v17   ;;  %238 = vperm.xlu0 %789, %v212_v18   ;;  %v199_v60 = vld [vmem:[%s983_s30 + $0x28] sm:$0xff]  ;;  %v208_v1 = vld [vmem:[%s983_s30 + $0x70] sm:$0xff]  ;;  %v209_v7 = vld [vmem:[%s983_s30 + $0x78] sm:$0xff]  ;;  %p800_p2 = por %p799_p1, %p798_p0 }
  0x22   : > { %v200_v2 = vld [vmem:[%s983_s30 + $0x30] sm:$0xff]  ;;  %v201_v8 = vld [vmem:[%s983_s30 + $0x38] sm:$0xff] }
  0x23   : > { %p801_p3 = pnand %p800_p2, %p794_p13 }
  0x25   : > { %283 = vperm.xlu1 %790, %v221_v19   ;;  %243 = vperm.xlu0 %789, %v213_v20  }
  0x29   : > { %288 = vperm.xlu1 %790, %v222_v21   ;;  %248 = vperm.xlu0 %789, %v214_v22  }
  0x2d   : > { %293 = vperm.xlu1 %790, %v223_v23   ;;  %253 = vperm.xlu0 %789, %v215_v24  }
  0x31   : > { %298 = vperm.xlu1 %790, %v224_v25   ;;  %258 = vperm.xlu0 %789, %v216_v26  }
  0x35   : > { %303 = vperm.xlu1 %790, %v225_v27   ;;  %263 = vperm.xlu0 %789, %v217_v28  }
  0x98   : > { %v234_v31 = vpop.permute.xlu1 %233  ;;  %v229_v32 = vpop.permute.xlu0 %228 }
  0x99   : > { %v307_v33 = vmul.f32 %v234_v31, %v195_v29  ;;  %v306_v34 = vmul.f32 %v229_v32, %v194_v30 }
  0x9b   : > { %699 = vmatprep.mubr.msk.f32.mxu0 %vm330_vm0, %v306_v34 }
  0x9c   : > { %v274_v37 = vpop.permute.xlu1 %273  ;;  %v269_v38 = vpop.permute.xlu0 %268  ;;  %700 = vmatmul.mubr.msk.f32.vlgmr.msra.gmra.mrb[0].mxu0 %vm330_vm0, %v307_v33 }
  0x9d   : > { %v315_v39 = vmul.f32 %v274_v37, %v203_v35  ;;  %v314_v40 = vmul.f32 %v269_v38, %v202_v36 }
  0x9f   : > { %711 = vmatprep.mubr.msk.f32.mxu1 %vm330_vm0, %v314_v40 }
  0xa0   : > { %v279_v43 = vpop.permute.xlu1 %278  ;;  %v239_v44 = vpop.permute.xlu0 %238  ;;  %712 = vmatmul.mubr.msk.f32.vlgmr.msra.gmra.mrb[0].mxu1 %vm330_vm0, %v315_v39 }
  0xa1   : > { %v316_v45 = vmul.f32 %v279_v43, %v204_v41  ;;  %v308_v46 = vmul.f32 %v239_v44, %v196_v42 }
  0xa3   : > { %702 = vmatprep.mubr.msk.f32.mxu0 %vm330_vm0, %v308_v46  ;;  %714 = vmatprep.mubr.msk.f32.mxu1 %vm330_vm0, %v316_v45 }
  0xa4   : > { %v284_v49 = vpop.permute.xlu1 %283  ;;  %v244_v50 = vpop.permute.xlu0 %243 }
  0xa5   : > { %v317_v51 = vmul.f32 %v284_v49, %v205_v47  ;;  %v309_v52 = vmul.f32 %v244_v50, %v197_v48 }
  0xa7   : > { %703 = vmatmul.mubr.msk.f32.gmra.mrb[2].mxu0 %vm330_vm0, %v309_v52  ;;  %715 = vmatmul.mubr.msk.f32.gmra.mrb[2].mxu1 %vm330_vm0, %v317_v51 }
  0xa8   : > { %v289_v55 = vpop.permute.xlu1 %288  ;;  %v249_v56 = vpop.permute.xlu0 %248 }
  0xa9   : > { %v318_v57 = vmul.f32 %v289_v55, %v206_v53  ;;  %v310_v58 = vmul.f32 %v249_v56, %v198_v54 }
  0xab   : > { %705 = vmatprep.mubr.msk.f32.mxu0 %vm330_vm0, %v310_v58  ;;  %717 = vmatprep.mubr.msk.f32.mxu1 %vm330_vm0, %v318_v57 }
  0xac   : > { %v294_v61 = vpop.permute.xlu1 %293  ;;  %v254_v62 = vpop.permute.xlu0 %253 }
  0xad   : > { %v319_v63 = vmul.f32 %v294_v61, %v207_v59  ;;  %v311_v0 = vmul.f32 %v254_v62, %v199_v60 }
  0xaf   : > { %706 = vmatmul.mubr.msk.f32.gmra.mrb[4].mxu0 %vm330_vm0, %v311_v0  ;;  %718 = vmatmul.mubr.msk.f32.gmra.mrb[4].mxu1 %vm330_vm0, %v319_v63 }
  0xb0   : > { %v299_v3 = vpop.permute.xlu1 %298  ;;  %v259_v4 = vpop.permute.xlu0 %258 }
  0xb1   : > { %v320_v5 = vmul.f32 %v299_v3, %v208_v1  ;;  %v312_v6 = vmul.f32 %v259_v4, %v200_v2 }
  0xb3   : > { %708 = vmatprep.mubr.msk.f32.mxu0 %vm330_vm0, %v312_v6  ;;  %720 = vmatprep.mubr.msk.f32.mxu1 %vm330_vm0, %v320_v5 }
  0xb4   : > { %v304_v9 = vpop.permute.xlu1 %303  ;;  %v264_v10 = vpop.permute.xlu0 %263 }
  0xb5   : > { %v321_v11 = vmul.f32 %v304_v9, %v209_v7  ;;  %v313_v12 = vmul.f32 %v264_v10, %v201_v8 }
  0xb7   : > { %709 = vmatmul.mubr.msk.f32.gmra.mrb[6].mxu0 %vm330_vm0, %v313_v12  ;;  %721 = vmatmul.mubr.msk.f32.gmra.mrb[6].mxu1 %vm330_vm0, %v321_v11 }
 0x16f   : > { %v701_v13 = vpop.f32.mrb[0].mxu0 }
 0x170   : > { %525 = vst [vmem:[%s1020_s5 + $0x8] sm:$0xff] %v701_v13  ;;  %v445_v14 = vpop.f32.mrb[1].mxu0 }
 0x171   : > { %524 = vst [vmem:[%s1020_s5] sm:$0xff] %v445_v14 }
 0x173   : > { %v713_v15 = vpop.f32.mrb[0].mxu1 }
 0x174   : > { %533 = vst [vmem:[%s1020_s5 + $0x48] sm:$0xff] %v713_v15  ;;  %v485_v16 = vpop.f32.mrb[1].mxu1 }
 0x175   : > { %532 = vst [vmem:[%s1020_s5 + $0x40] sm:$0xff] %v485_v16 }
 0x17a   : > { %v704_v17 = vpop.f32.mrb[2].mxu0  ;;  %v716_v18 = vpop.f32.mrb[2].mxu1 }
 0x17b   : > { %527 = vst [vmem:[%s1020_s5 + $0x18] sm:$0xff] %v704_v17  ;;  %535 = vst [vmem:[%s1020_s5 + $0x58] sm:$0xff] %v716_v18  ;;  %v455_v19 = vpop.f32.mrb[3].mxu0  ;;  %v495_v20 = vpop.f32.mrb[3].mxu1 }
 0x17c   : > { %526 = vst [vmem:[%s1020_s5 + $0x10] sm:$0xff] %v455_v19  ;;  %534 = vst [vmem:[%s1020_s5 + $0x50] sm:$0xff] %v495_v20 }
 0x182   : > { %v707_v21 = vpop.f32.mrb[4].mxu0  ;;  %v719_v22 = vpop.f32.mrb[4].mxu1 }
 0x183   : > { %529 = vst [vmem:[%s1020_s5 + $0x28] sm:$0xff] %v707_v21  ;;  %537 = vst [vmem:[%s1020_s5 + $0x68] sm:$0xff] %v719_v22  ;;  %v465_v23 = vpop.f32.mrb[5].mxu0  ;;  %v505_v24 = vpop.f32.mrb[5].mxu1 }
 0x184   : > { %528 = vst [vmem:[%s1020_s5 + $0x20] sm:$0xff] %v465_v23  ;;  %536 = vst [vmem:[%s1020_s5 + $0x60] sm:$0xff] %v505_v24 }
 0x18a   : > { %v710_v25 = vpop.f32.mrb[6].mxu0  ;;  %v722_v26 = vpop.f32.mrb[6].mxu1 }
 0x18b   : > { %531 = vst [vmem:[%s1020_s5 + $0x38] sm:$0xff] %v710_v25  ;;  %539 = vst [vmem:[%s1020_s5 + $0x78] sm:$0xff] %v722_v26  ;;  %v475_v27 = vpop.f32.mrb[7].mxu0  ;;  %v515_v28 = vpop.f32.mrb[7].mxu1 }
 0x18c   : > { %530 = vst [vmem:[%s1020_s5 + $0x30] sm:$0xff] %v475_v27  ;;  %538 = vst [vmem:[%s1020_s5 + $0x70] sm:$0xff] %v515_v28 }
 0x18d   : > { %804 = shalt.err (!%p801_p3)
}
 0x18e   : > { %s805_s25 = scalar_lea.hbm %s1039_s10, 2048  ;;  %s809_s28 = scalar_lea.hbm %s1093_s3, 4096 }
 0x18f   : > { %p806_p4 = scmp.ne.s32.totalorder %s1039_s10, %s805_s25  ;;  %p810_p9 = scmp.lt.u32.totalorder %s1039_s10, %s1093_s3 }
 0x190   : > { %p811_p10 = scmp.lt.u32.totalorder %s809_s28, %s805_s25  ;;  %p813_p12 = scmp.lt.u32.totalorder %s805_s25, %s1039_s10 }
 0x191   : > { %p807_p7 = pnand %p806_p4, %p917_p5 }
 0x192   : > { %p812_p11 = por %p811_p10, %p810_p9 }
 0x193   : > { %p808_p8 = pneg %p807_p7 }
 0x194   : > { %p814_p13 = por %p813_p12, %p812_p11 }
 0x196   : > { %p815_p0 = pnand %p814_p13, %p808_p8 }
 0x198   : > { %818 = shalt.err (!%p815_p0)
}
 0x199   : > { %s857_s24 = smov 128   ;;  %s858_s4 = smov 8  }
 0x19a   : > { %747 = dma.vmem_to_hbm [thread:$0]  (%p917_p5), %s1041_s7, 2048, %s1039_s10, %s1049_s16, %s857_s24, %s857_s24, %s858_s4  }
 0x19b PF: > { %p753_p1 = scmp.ge.s32.totalorder %s853_s15, 2  ;;  %s569_s5 = sand.u32 1, %s841_s12  }
 0x19c   : > { %s570_s6 = scalar_lea.sflag [#allocation3], %s569_s5 }
 0x19d   : > { %p750_p2 = pnand %p753_p1, %p921_p6 }
 0x19f   : > { %836 = dma.done.wait (!%p750_p2), %s570_s6, 2048  }
 0x1a0   : > { %838 = vsyncadd (!%p750_p2), %s570_s6, 4294965248  ;;  %p13_p3 = scmp.ge.s32.totalorder %s904_s18, 4   ;;  %s1096_s12 = smov %s845_s13 }
 0x1a1   : > { %s1097_s13 = smov %s849_s14  ;;  %s1098_s14 = smov %s915_s21 }
 0x1a2   : > { %s1099_s15 = smov %s904_s18  ;;  %15 = sbr.rel (!%p13_p3) target bundleno = 3 (0x3), region = 70 }
 0x1a9   :  { %575 = vsyncpa [#allocation3], 1 }
 0x1aa   :  { %577 = vsyncpa [#allocation3 + $0x1], 1 }

</bundles_post_ra>
